<compile_context>
chip_gen: v5e
topology: v5e:2x2
jax: 0.10.0
libtpu: 0.0.40
codegen_flags: <defaults>
</compile_context>

<pallas_src>
import math

import jax
import jax.numpy as jnp
from jax.experimental import pallas as pl
from jax.experimental.pallas import tpu as pltpu


def _outconv_kernel(x_ref, w_ref, b_ref, o_ref):
    # x_ref: (Cin, tS)   lane-dense spatial block
    # w_ref: (Cout, Cin) resident weight (constant index_map)
    # b_ref: (Cout, 1)   bias, broadcast over lanes
    # o_ref: (Cout, tS)  lane-dense output block
    acc = jnp.dot(w_ref[...], x_ref[...], preferred_element_type=jnp.float32)
    o_ref[...] = (acc + b_ref[...]).astype(o_ref.dtype)


def _round_up(x, m):
    return (x + m - 1) // m * m


def _device_kind():
    try:
        return jax.devices()[0].device_kind.lower()
    except Exception:  # e.g. interpret mode / no device
        return ""


def _default_vmem_budget_bytes():
    kind = _device_kind()
    if "v5" in kind and ("lite" in kind or "v5e" in kind):
        return 10 * 1024 * 1024      # v5e: overhead already <6%, stay small
    if "v7" in kind:
        return 22 * 1024 * 1024      # v7x: bigger steps amortize 0.35us/step
    return 20 * 1024 * 1024          # v6e / unknown


def _has_two_tensorcores():
    kind = _device_kind()
    return ("v7" in kind) or ("v4" in kind) or ("v5p" in kind)


def _padded_wb_bytes(cin, cout, itemsize, sublane):
    """Double-buffered, (sublane,128)-padded resident weight + bias bytes."""
    cout_p = _round_up(cout, sublane)
    w_bytes = cout_p * _round_up(max(cin, 1), 128) * itemsize
    b_bytes = cout_p * 128 * itemsize
    return 2 * (w_bytes + b_bytes)


def _choose_spatial_tile(cin, cout, s, itemsize, vmem_budget_bytes):
    """Largest 128-aligned spatial tile whose padded, double-buffered x+out
    blocks (plus resident W/b buffers) fit in the budget."""
    sublane = 8 * (4 // itemsize)               # 8 (f32) / 16 (bf16) / 32 (i8)
    cin_p = _round_up(cin, sublane)
    cout_p = _round_up(cout, sublane)
    budget = vmem_budget_bytes - _padded_wb_bytes(cin, cout, itemsize, sublane)
    budget = max(budget, 0)
    # Double-buffered x block + double-buffered out block per 128-lane column.
    bytes_per_col = 2 * (cin_p + cout_p) * itemsize
    ts = (budget // bytes_per_col) // 128 * 128
    ts = max(128, ts)
    if ts >= s:
        # Full spatial extent in one block (legal even when S % 128 != 0).
        return s
    return ts


def _balance_for_two_cores(n, s, ts):
    """If the (batch x spatial-tile) grid has an odd number of work units,
    split the spatial axis one step finer so both TensorCores stay busy."""
    num = pl.cdiv(s, ts)
    if (n * num) % 2 == 0 or s <= 128:
        return ts, num
    ts2 = _round_up(pl.cdiv(s, num + 1), 128)
    if ts2 >= s:
        return ts, num
    num2 = pl.cdiv(s, ts2)
    if (n * num2) % 2 == 0:
        return ts2, num2
    return ts, num


def outconv_pallas(x, weight, bias, *, vmem_budget_bytes=None):
    """1x1x1 Conv3d (OutConv) forward.

    x:      (N, Cin, D, H, W)   float32 (bf16 also supported)
    weight: (Cout, Cin, 1, 1, 1)
    bias:   (Cout,)
    returns (N, Cout, D, H, W)
    """
    n, cin, d, h, w = x.shape
    cout = weight.shape[0]
    s = d * h * w

    # Free, contiguous reshapes — no transpose, no pad.
    x3 = x.reshape(n, cin, s)                        # (N, Cin, S)
    w2d = weight.reshape(cout, cin).astype(x.dtype)  # (Cout, Cin)
    b2d = bias.reshape(cout, 1).astype(jnp.float32)  # (Cout, 1), f32 add

    itemsize = jnp.dtype(x.dtype).itemsize
    if vmem_budget_bytes is None:
        vmem_budget_bytes = _default_vmem_budget_bytes()

    ts = _choose_spatial_tile(cin, cout, s, itemsize, vmem_budget_bytes)
    if _has_two_tensorcores():
        ts, num_s_tiles = _balance_for_two_cores(n, s, ts)
    else:
        num_s_tiles = pl.cdiv(s, ts)                 # ragged tail is masked

    # Explicit VMEM limit: double-buffered padded x+out blocks, resident
    # (double-buffered, padded) W/b, plus headroom for Mosaic scratch.
    sublane = 8 * (4 // itemsize)
    cin_p = _round_up(cin, sublane)
    cout_p = _round_up(cout, sublane)
    ts_p = _round_up(ts, 128)
    vmem_limit = (2 * (cin_p + cout_p) * ts_p * itemsize
                  + _padded_wb_bytes(cin, cout, itemsize, sublane)
                  + 4 * 1024 * 1024)
    vmem_limit = max(vmem_limit, 16 * 1024 * 1024)
    vmem_limit = min(vmem_limit, 48 * 1024 * 1024)   # stay safe on v7x (64 MiB/TC)

    grid = (n, num_s_tiles)
    out3 = pl.pallas_call(
        _outconv_kernel,
        out_shape=jax.ShapeDtypeStruct((n, cout, s), x.dtype),
        grid_spec=pltpu.PrefetchScalarGridSpec(
            num_scalar_prefetch=0,
            grid=grid,
            in_specs=[
                # x: batch dim squeezed, channels on sublanes, spatial on lanes.
                pl.BlockSpec((None, cin, ts), lambda b, j: (b, 0, j)),
                # Weight & bias: constant block index -> fetched once, resident.
                pl.BlockSpec((cout, cin), lambda b, j: (0, 0)),
                pl.BlockSpec((cout, 1), lambda b, j: (0, 0)),
            ],
            out_specs=pl.BlockSpec((None, cout, ts), lambda b, j: (b, 0, j)),
        ),
        compiler_params=pltpu.CompilerParams(
            dimension_semantics=("parallel", "parallel"),
            vmem_limit_bytes=int(vmem_limit),
        ),
    )(x3, w2d, b2d)

    return out3.reshape(n, cout, d, h, w)


def init_outconv_params(key, in_channels, out_channels):
    # Deterministic init mimicking nn.Conv3d default (kaiming-uniform-ish).
    kw, kb = jax.random.split(key)
    fan_in = in_channels * 1 * 1 * 1
    bound = 1.0 / math.sqrt(fan_in)
    weight = jax.random.uniform(
        kw, (out_channels, in_channels, 1, 1, 1),
        minval=-bound, maxval=bound, dtype=jnp.float32)
    bias = jax.random.uniform(
        kb, (out_channels,), minval=-bound, maxval=bound, dtype=jnp.float32)
    return weight, bias


if __name__ == "__main__":
    key = jax.random.PRNGKey(0)
    k_x, k_p = jax.random.split(key)

    N, Cin, Cout, D, H, W = 2, 4, 3, 8, 8, 8
    x = jax.random.normal(k_x, (N, Cin, D, H, W), dtype=jnp.float32)
    weight, bias = init_outconv_params(k_p, Cin, Cout)

    out = jax.block_until_ready(outconv_pallas(x, weight, bias))

    # Reference check in plain JAX (same math as nn.Conv3d kernel_size=1).
    ref = jnp.einsum("ncdhw,oc->nodhw", x, weight.reshape(Cout, Cin)) \
          + bias.reshape(1, Cout, 1, 1, 1)
    assert out.shape == (N, Cout, D, H, W)
    assert jnp.allclose(out, ref, atol=1e-5, rtol=1e-5)

    # Second check with an odd batch / non-128-multiple spatial extent to
    # exercise the ragged tail and the two-core balancing path.
    x2 = jax.random.normal(k_x, (1, Cin, 5, 7, 9), dtype=jnp.float32)
    out2 = jax.block_until_ready(outconv_pallas(x2, weight, bias))
    ref2 = jnp.einsum("ncdhw,oc->nodhw", x2, weight.reshape(Cout, Cin)) \
           + bias.reshape(1, Cout, 1, 1, 1)
    assert jnp.allclose(out2, ref2, atol=1e-5, rtol=1e-5)

    print("KERNEL_OK")
</pallas_src>

<mosaic_0001>
module attributes {stable_mosaic.version = 11 : i64} {
  func.func @_outconv_kernel(%arg0: i32, %arg1: i32, %arg2: memref<1x4x512xf32, #tpu.memory_space<vmem>>, %arg3: memref<3x4xf32, #tpu.memory_space<vmem>>, %arg4: memref<3x1xf32, #tpu.memory_space<vmem>>, %arg5: memref<1x3x512xf32, #tpu.memory_space<vmem>>) attributes {dimension_semantics = [#tpu.dimension_semantics<parallel>, #tpu.dimension_semantics<parallel>], iteration_bounds = array<i64: 2, 1>, scalar_prefetch = 0 : i64, scratch_operands = 0 : i64, tpu.core_type = #tpu.core_type<tc>, window_params = [{transform_indices = @transform_0, window_bounds = array<i64: 1, 4, 512>}, {pipeline_mode = #tpu.pipeline_mode<synchronous>, transform_indices = @transform_1, window_bounds = array<i64: 3, 4>}, {pipeline_mode = #tpu.pipeline_mode<synchronous>, transform_indices = @transform_2, window_bounds = array<i64: 3, 1>}, {transform_indices = @transform_3, window_bounds = array<i64: 1, 3, 512>}]} {
    %c0 = arith.constant 0 : index
    %c0_0 = arith.constant 0 : index
    %0 = vector.load %arg3[%c0, %c0_0] : memref<3x4xf32, #tpu.memory_space<vmem>>, vector<3x4xf32>
    %c0_1 = arith.constant 0 : index
    %c0_2 = arith.constant 0 : index
    %c0_3 = arith.constant 0 : index
    %1 = vector.load %arg2[%c0_1, %c0_2, %c0_3] : memref<1x4x512xf32, #tpu.memory_space<vmem>>, vector<1x4x512xf32>
    %2 = vector.shape_cast %1 : vector<1x4x512xf32> to vector<4x512xf32>
    %cst = arith.constant dense<0.000000e+00> : vector<3x512xf32>
    %3 = tpu.matmul %0, %2, %cst {dimension_numbers = #tpu.dot_dimension_numbers<[1], [0], [0], [1], [0, 0, 1, 1], [], []>} : vector<3x4xf32>, vector<4x512xf32>, vector<3x512xf32> -> vector<3x512xf32>
    %c0_4 = arith.constant 0 : index
    %c0_5 = arith.constant 0 : index
    %4 = vector.load %arg4[%c0_4, %c0_5] : memref<3x1xf32, #tpu.memory_space<vmem>>, vector<3x1xf32>
    %5 = vector.broadcast %4 : vector<3x1xf32> to vector<3x512xf32>
    %6 = arith.addf %3, %5 : vector<3x512xf32>
    %c0_6 = arith.constant 0 : index
    %c0_7 = arith.constant 0 : index
    %c0_8 = arith.constant 0 : index
    %7 = vector.load %arg5[%c0_6, %c0_7, %c0_8] : memref<1x3x512xf32, #tpu.memory_space<vmem>>, vector<1x3x512xf32>
    %8 = vector.shape_cast %7 : vector<1x3x512xf32> to vector<3x512xf32>
    %9 = vector.shape_cast %6 : vector<3x512xf32> to vector<1x3x512xf32>
    tpu.vector_store %arg5[%c0_6, %c0_7, %c0_8], %9 {strides = array<i32>} : memref<1x3x512xf32, #tpu.memory_space<vmem>>, vector<1x3x512xf32>,
    return
  }
  func.func @transform_0(%arg0: i32, %arg1: i32) -> (i32, i32, i32) {
    %c0_i32 = arith.constant 0 : i32
    %c0_i32_0 = arith.constant 0 : i32
    return %arg0, %c0_i32, %arg1 : i32, i32, i32
  }
  func.func @transform_1(%arg0: i32, %arg1: i32) -> (i32, i32) {
    %c0_i32 = arith.constant 0 : i32
    %c0_i32_0 = arith.constant 0 : i32
    %c0_i32_1 = arith.constant 0 : i32
    return %c0_i32, %c0_i32_0 : i32, i32
  }
  func.func @transform_2(%arg0: i32, %arg1: i32) -> (i32, i32) {
    %c0_i32 = arith.constant 0 : i32
    %c0_i32_0 = arith.constant 0 : i32
    %c0_i32_1 = arith.constant 0 : i32
    return %c0_i32, %c0_i32_0 : i32, i32
  }
  func.func @transform_3(%arg0: i32, %arg1: i32) -> (i32, i32, i32) {
    %c0_i32 = arith.constant 0 : i32
    %c0_i32_0 = arith.constant 0 : i32
    return %arg0, %c0_i32, %arg1 : i32, i32, i32
  }
}

</mosaic_0001>

<bundles_post_ra>
// kernel: tpu_custom_call.1
= control target key start
LH: loop header
LB: loop body
LE: loop exit
PB: predicated region body
PF: predicated region fallthrough
CT: control target
= control target key end

     0   :  { %8 = vsyncpa [#allocation3], 0  ;;  %s720_s0 = inlined_call_operand.hbm [shape: f32[2,4,512], index: 0, kind: input, shape index: {}]   ;;  %s721_s1 = inlined_call_operand.vmem [shape: f32[3,4], index: 1, kind: input, shape index: {}]   ;;  %s722_s2 = inlined_call_operand.vmem [shape: f32[3,1], index: 2, kind: input, shape index: {}]   ;;  %s723_s3 = inlined_call_operand.vmem [shape: f32[2,3,512], index: 3, kind: output, shape index: {}]  }
   0x1   :  { %10 = vsyncpa [#allocation3 + $0x1], 0  ;;  %s620_s12 = smov 0   ;;  %s622_s13 = smov 0  }
   0x2   :  { %s624_s14 = smov 0   ;;  %s626_s15 = smov 0  }
   0x3   :  { %s628_s16 = smov 0   ;;  %s630_s17 = smov 0  }
   0x4 LB: > { %s437_s18 = sadd.s32 4294967295, %s597_s17   ;;  %s28_s19 = sadd.s32 1, %s593_s16  ;;  %s597_s17 = sphi %s630_s17, %s16_s17   ;;  %s593_s16 = sphi %s628_s16, %s730_s16   ;;  %s589_s15 = sphi %s626_s15, %s729_s15   ;;  %s585_s14 = sphi %s624_s14, %s728_s14   ;;  %s581_s13 = sphi %s622_s13, %s727_s13   ;;  %s577_s12 = sphi %s620_s12, %s726_s12  }
   0x5   : > { %p30_p0 = scmp.ge.s32.totalorder %s28_s19, 2  ;;  %s37_s20 = sadd.s32 1, %s585_s14 }
   0x6   : > { %p44_p1 = scmp.ne.s32.totalorder %s585_s14, %s581_s13  ;;  %p45_p2 = scmp.eq.s32.totalorder %s597_s17, 0 }
   0x7   : > { %s732_s19 = smov (%p30_p0, %s28_s19), 0  ;;  %p50_p4 = scmp.ne.s32.totalorder %s581_s13, %s577_s12 }
   0x8   : > { %p656_p3 = por %p45_p2, %p44_p1  ;;  %s32_s22 = ssub.s32 %s593_s16, %s732_s19 }
   0x9   : > { %p51_p5 = scmp.eq.s32.totalorder %s437_s18, 0  ;;  %p35_p6 = scmp.eq.s32.totalorder %s32_s22, 0 }
   0xa   : > { %p466_p8 = scmp.lt.s32.totalorder %s597_s17, 2  ;;  %s150_s25 = sand.u32 1, %s585_s14  }
   0xb   : > { %p663_p7 = por %p51_p5, %p50_p4  ;;  %s458_s26 = sshll.u32 %s593_s16, 4 }
   0xc   : > { %s669_s24 = scalar_select %p35_p6, %s585_s14, %s37_s20  }
   0xd   : > { %s441_s27 = sshll.u32 %s150_s25, 4  ;;  %s161_s30 = scalar_lea.hbm %s720_s0, %s458_s26 }
   0xe   : > { %s163_s4 = sshll.u32 %s161_s30, 4  ;;  %s154_s5 = scalar_lea.vmem [#allocation2], %s441_s27  ;;  %s164_s4 = int_to_ptr.hbm [resolvable:$true] %s163_s4 }
   0xf   : > { %s165_s6 = sshll.u32 %s154_s5, 4  ;;  %p463_p9 = pnand %p466_p8, %p656_p3  ;;  %s166_s6 = int_to_ptr.vmem [resolvable:$true] %s165_s6 }
  0x10   : > { %p444_p10 = scmp.ge.s32.totalorder %s597_s17, 1  ;;  %p170_p11 = scmp.lt.s32.totalorder %s597_s17, 3 }
  0x11   : > { %s151_s7 = scalar_lea.sflag [#allocation3], %s150_s25 }
  0x12   : > { %465 = dma.hbm_to_vmem [thread:$0]  (!%p463_p9), %s164_s4, 256, %s166_s6, %s151_s7  }
  0x13   : > { %p171_p12 = pnand %p444_p10, %p170_p11 }
  0x14   : > { %s176_s8 = sand.u32 (!%p171_p12), 1, %s581_s13  }
  0x15   : > { %174 = sbr.rel (%p171_p12) target bundleno = 175 (0xaf), region = 32  ;;  %s445_s9 = sshll.u32 (!%p171_p12), %s176_s8, 4 }
  0x16   : > { %s177_s10 = scalar_lea.sflag (!%p171_p12), [#allocation3], %s176_s8  ;;  %s180_s11 = scalar_lea.vmem (!%p171_p12), [#allocation2], %s445_s9 }
  0x1a   : > { %572 = dma.done.wait (%p663_p7), %s177_s10, 256  }
  0x1b   : > { %574 = vsyncadd (%p663_p7), %s177_s10, 4294967040  ;;  %v599_v0 = vmov 0   ;;  %v221_v1 = vld [vmem:[%s180_s11 + $0x8] sm:$0xff]  ;;  %v220_v2 = vld [vmem:[%s180_s11] sm:$0xff]  ;;  %vm241_vm0 = vcmask 1043456   ;;  %vm237_vm1 = vcmask 31744  }
  0x1c   : > { %516 = vset.pattern.permute.xlu0 %v599_v0  ;;  %232 = vst [vmem:[#allocation1 + $0x10] ss:$2 sm:$0xff] %v221_v1  ;;  %v222_v3 = vld [vmem:[%s722_s2] sm:$0x7]  ;;  %p210_p13 = scmp.lt.s32.totalorder %s589_s15, 1 }
  0x1d   : > { %230 = vst [vmem:[#allocation1] ss:$2 sm:$0xff] %v220_v2  ;;  %225 = vperm.xlu0 %516, %v222_v3   ;;  %v219_v4 = vld [vmem:[%s721_s1] sm:$0x7] }
  0x1e   : > { %s734_s15 = smov (!%p210_p13, %s589_s15), 1 }
  0x1f   : > { %s459_s22 = sshll.u32 %s734_s15, 4 }
  0x20   : > { %s217_s26 = scalar_lea.vmem %s723_s3, %s459_s22 }
  0x23   : > { %v235_v5 = vld.sshfl [vmem:[#allocation1 + $0x10] sm:$0xff pattern:$0x75316420]  ;;  %v236_v6 = vld.sshfl [vmem:[#allocation1 + $0x18] sm:$0xff pattern:$0x75316420] }
  0x24   : > { %452 = vmatpush.msk.msra.mxu2 %vm241_vm0, %v235_v5  ;;  %454 = vmatpush.msk.msra.mxu3 %vm241_vm0, %v236_v6  ;;  %v234_v7 = vld.sshfl [vmem:[#allocation1 + $0x8] sm:$0xff pattern:$0x75316420]  ;;  %v233_v8 = vld.sshfl [vmem:[#allocation1] sm:$0xff pattern:$0x75316420] }
  0x25   : > { %453 = vmatmul.msk.f32.vlgmr.msra.gmra.mxu2 %vm237_vm1, %v219_v4  ;;  %455 = vmatmul.msk.f32.vlgmr.msra.gmra.mxu3 %vm237_vm1, %v219_v4 }
  0x26   : > { %450 = vmatpush.msk.msra.mxu1 %vm241_vm0, %v234_v7  ;;  %448 = vmatpush.msk.msra.mxu0 %vm241_vm0, %v233_v8 }
  0x27   : > { %451 = vmatmul.msk.f32.vlgmr.msra.gmra.mxu1 %vm237_vm1, %v219_v4  ;;  %449 = vmatmul.msk.f32.vlgmr.msra.gmra.mxu0 %vm237_vm1, %v219_v4 }
  0x8f   : > { %v226_v9 = vpop.permute.xlu0 %225 }
  0xa4   : > { %v287_v10 = vpop.f32.mrf.mxu1  ;;  %v267_v11 = vpop.f32.mrf.mxu0 }
  0xa5   : > { %v288_v12 = vadd.f32 %v287_v10, %v226_v9  ;;  %v268_v13 = vadd.f32 %v267_v11, %v226_v9 }
  0xa7   : > { %v334_v14 = vrot.slane %v288_v12, 4 }
  0xa8   : > { %v307_v15 = vpop.f32.mrf.mxu2  ;;  %v327_v16 = vpop.f32.mrf.mxu3 }
  0xa9   : > { %v336_v17 = vsel %vm241_vm0, %v268_v13, %v334_v14  ;;  %v328_v18 = vadd.f32 %v327_v16, %v226_v9  ;;  %v308_v19 = vadd.f32 %v307_v15, %v226_v9 }
  0xaa   : > { %340 = vst [vmem:[%s217_s26] sm:$0x77] %v336_v17 }
  0xab   : > { %v335_v20 = vrot.slane %v328_v18, 4 }
  0xad   : > { %v337_v21 = vsel %vm241_vm0, %v308_v19, %v335_v20 }
  0xae   : > { %341 = vst [vmem:[%s217_s26 + $0x8] sm:$0x77] %v337_v21 }
  0xaf PF: > { %s16_s17 = sadd.s32 1, %s597_s17   ;;  %s726_s12 = smov %s581_s13 }
  0xb0   : > { %p13_p0 = scmp.ge.s32.totalorder %s16_s17, 4   ;;  %s727_s13 = smov %s585_s14 }
  0xb1   : > { %s728_s14 = smov %s669_s24  ;;  %s729_s15 = smov %s593_s16 }
  0xb2   : > { %s730_s16 = smov %s732_s19  ;;  %15 = sbr.rel (!%p13_p0) target bundleno = 4 (0x4), region = 73 }
  0xb7   :  { %372 = vsyncpa [#allocation3], 1 }
  0xb8   :  { %374 = vsyncpa [#allocation3 + $0x1], 1 }

</bundles_post_ra>
